<compile_context>
chip_gen: v7x
topology: tpu7x:2x2x1
jax: 0.10.0
libtpu: 0.0.40
codegen_flags: <defaults>
</compile_context>

<pallas_src>
import functools

import jax
import jax.numpy as jnp
from jax import lax
from jax.experimental import pallas as pl
from jax.experimental.pallas import tpu as pltpu


def node_to_adj_kernel(xr_ref, xf_ref, w2_ref, t_ref, r_ref, o_ref, *, threshold):
    bt, n, c = xr_ref.shape                     # (block_batch, num_node, in_channel)
    nc = n * c

    # Upcast before the multiplies (f32 products regardless of input dtype).
    xr = xr_ref[...].astype(jnp.float32)        # (bt, n, c)   x[b,i,c]
    xf = xf_ref[...].astype(jnp.float32)        # (bt, 1, nc)  x[b,j,c], (j,c) on lanes
    w2 = w2_ref[...].astype(jnp.float32)        # (n, nc)      Wsym[i,j,c], (j,c) on lanes

    # MXU (idle unit): broadcast x[b,i,:] across every j lane group.
    #   x_tile[(b,i), j*C + c'] = x[b,i,c']      ((bt*n, c) @ (c, n*c))
    x_tile = jnp.dot(xr.reshape(bt * n, c), t_ref[...],
                     preferred_element_type=jnp.float32)          # (bt*n, nc)

    # Two fully lane-dense VPU passes — the dominant cost of the kernel.
    m = (xf * w2[None, :, :]).reshape(bt * n, nc)   # x[b,j,c] * Wsym[i,j,c]
    p = m * x_tile                                  #          * x[b,i,c]

    # MXU: segmented reduction over c.
    #   s[(b,i), j] = sum_c p[(b,i), j*C + c]     ((bt*n, n*c) @ (n*c, n))
    s = jnp.dot(p, r_ref[...], preferred_element_type=jnp.float32)  # (bt*n, n)

    # Epilogue with selects (no mul/add/cast arithmetic).
    pred = jax.nn.sigmoid(s).reshape(bt, n, n)
    rows = lax.broadcasted_iota(jnp.int32, (bt, n, n), 1)
    cols = lax.broadcasted_iota(jnp.int32, (bt, n, n), 2)
    pred = jnp.where(rows == cols, jnp.float32(1.0), pred)          # diagonal := 1
    pred = jnp.where(pred > threshold, pred, jnp.float32(0.0))      # threshold

    o_ref[...] = pred.astype(o_ref.dtype)


def _pick_block_batch(B, N, C, target_bytes=8 << 20):
    """Batches per grid step.

    Sized so the ~3 lane-dense (bt*N, N*C) f32 intermediates plus the
    double-buffered x/out blocks stay near `target_bytes` (big enough to
    amortize the ~0.35us/step pipeline overhead, small enough for v7x's
    tighter VMEM), while keeping >= 4 grid steps when the batch allows it
    (>= 2 steps per TensorCore on v7x) and bt | B.
    """
    per_b = 4 * (3 * N * N * C + 4 * N * C + 2 * N * N)
    bt = max(1, min(B, target_bytes // max(per_b, 1)))
    if B >= 4:
        bt = min(bt, B // 4)
    elif B >= 2:
        bt = min(bt, B // 2)
    while bt > 1 and B % bt != 0:
        bt -= 1
    return max(bt, 1)


def node_to_adj(x, weight, num_node, threshold=0.01, block_batch=None):
    """x: (B*N, C), weight: (1, N, N, C)  ->  (B*N, N), matching the PyTorch module."""
    BN, C = x.shape
    N = num_node
    assert BN % N == 0
    B = BN // N
    f32 = jnp.float32

    # Pre-symmetrize once: sigmoid(s + s^T) == sigmoid(sum_c x_i x_j (W_ij + W_ji)),
    # and pack (j, c) onto the lane axis.
    w = weight.reshape(N, N, C).astype(f32)
    w2 = (w + jnp.transpose(w, (1, 0, 2))).reshape(N, N * C)        # (N, N*C)

    xr = x.reshape(B, N, C)          # x[b,i,c]                  (contiguous, free)
    xf = x.reshape(B, 1, N * C)      # x[b,j,c] packed on lanes  (contiguous, free)

    # Constant 0/1 selector matrices driving the idle MXU:
    #   T[c, j*C+c'] = (c == c')   -> broadcasts x[b,i,:] across all j lanes.
    #   R[j*C+c, j'] = (j == j')   -> segmented sum over c.
    t_mat = jnp.tile(jnp.eye(C, dtype=f32), (1, N))                 # (C, N*C)
    r_mat = jnp.repeat(jnp.eye(N, dtype=f32), C, axis=0)            # (N*C, N)

    bt = block_batch if block_batch is not None else _pick_block_batch(B, N, C)
    assert B % bt == 0

    kernel = functools.partial(node_to_adj_kernel, threshold=threshold)

    # Explicit VMEM budget: 3 lane-dense (bt*N, N*C) f32 intermediates +
    # double-buffered x/out blocks + (double-buffered) grid-invariant
    # weight/selectors, with 2x headroom (floor 16 MiB, cap 64 MiB).
    inter = 4 * 3 * bt * N * N * C
    blocks = 4 * 2 * (2 * bt * N * C + bt * N * N)
    invar = 4 * 2 * (N * N * C + N * C * C + N * C * N)
    need = inter + blocks + invar
    vmem_limit = int(min(64 << 20, max(16 << 20, 2 * need)))

    out = pl.pallas_call(
        kernel,
        out_shape=jax.ShapeDtypeStruct((B, N, N), x.dtype),
        grid_spec=pltpu.PrefetchScalarGridSpec(
            num_scalar_prefetch=0,
            grid=(B // bt,),
            in_specs=[
                pl.BlockSpec((bt, N, C), lambda b: (b, 0, 0)),        # x rows (i-side)
                pl.BlockSpec((bt, 1, N * C), lambda b: (b, 0, 0)),    # x lane-packed (j-side)
                pl.BlockSpec((N, N * C), lambda b: (0, 0)),           # symmetrized weight
                pl.BlockSpec((C, N * C), lambda b: (0, 0)),           # broadcast selector T
                pl.BlockSpec((N * C, N), lambda b: (0, 0)),           # reduce selector R
            ],
            out_specs=pl.BlockSpec((bt, N, N), lambda b: (b, 0, 0)),
        ),
        compiler_params=pltpu.CompilerParams(
            dimension_semantics=("parallel",),
            vmem_limit_bytes=vmem_limit,
        ),
    )(xr, xf, w2, t_mat, r_mat)

    return out.reshape(B * N, N)


if __name__ == "__main__":
    key = jax.random.PRNGKey(0)
    k_x, k_w = jax.random.split(key)

    B, N, C = 8, 8, 32           # batch, num_node, in_channel (small demo shapes)
    threshold = 0.01

    x = jax.random.normal(k_x, (B * N, C), dtype=jnp.float32)
    weight = jax.random.normal(k_w, (1, N, N, C), dtype=jnp.float32)  # nn.Parameter init

    out = node_to_adj(x, weight, N, threshold)
    out = jax.block_until_ready(out)

    # Pure-JAX reference mirroring the PyTorch forward exactly (unsymmetrized weight).
    pa = (x.reshape(B, N, 1, C) * x.reshape(B, 1, N, C) * weight).sum(-1)
    pa = jax.nn.sigmoid(pa + jnp.transpose(pa, (0, 2, 1)))
    eye = jnp.eye(N, dtype=pa.dtype)
    pa = pa * (1.0 - eye) + eye
    pa = pa * (pa > threshold)
    ref = pa.reshape(B * N, N)

    assert out.shape == (B * N, N)
    assert jnp.allclose(out, ref, atol=1e-4, rtol=1e-4), "mismatch vs reference"
    print("KERNEL_OK")
</pallas_src>

<mosaic_0001>
module attributes {stable_mosaic.version = 11 : i64} {
  func.func @node_to_adj_kernel(%arg0: i32, %arg1: memref<2x8x32xf32, #tpu.memory_space<vmem>>, %arg2: memref<2x1x256xf32, #tpu.memory_space<vmem>>, %arg3: memref<8x256xf32, #tpu.memory_space<vmem>>, %arg4: memref<32x256xf32, #tpu.memory_space<vmem>>, %arg5: memref<256x8xf32, #tpu.memory_space<vmem>>, %arg6: memref<2x8x8xf32, #tpu.memory_space<vmem>>) attributes {dimension_semantics = [#tpu.dimension_semantics<parallel>], iteration_bounds = array<i64: 4>, scalar_prefetch = 0 : i64, scratch_operands = 0 : i64, tpu.core_type = #tpu.core_type<tc>, window_params = [{transform_indices = @transform_0, window_bounds = array<i64: 2, 8, 32>}, {transform_indices = @transform_1, window_bounds = array<i64: 2, 1, 256>}, {pipeline_mode = #tpu.pipeline_mode<synchronous>, transform_indices = @transform_2, window_bounds = array<i64: 8, 256>}, {pipeline_mode = #tpu.pipeline_mode<synchronous>, transform_indices = @transform_3, window_bounds = array<i64: 32, 256>}, {pipeline_mode = #tpu.pipeline_mode<synchronous>, transform_indices = @transform_4, window_bounds = array<i64: 256, 8>}, {transform_indices = @transform_5, window_bounds = array<i64: 2, 8, 8>}]} {
    %c0 = arith.constant 0 : index
    %c0_0 = arith.constant 0 : index
    %c0_1 = arith.constant 0 : index
    %0 = vector.load %arg1[%c0, %c0_0, %c0_1] : memref<2x8x32xf32, #tpu.memory_space<vmem>>, vector<2x8x32xf32>
    %c0_2 = arith.constant 0 : index
    %c0_3 = arith.constant 0 : index
    %c0_4 = arith.constant 0 : index
    %1 = vector.load %arg2[%c0_2, %c0_3, %c0_4] : memref<2x1x256xf32, #tpu.memory_space<vmem>>, vector<2x1x256xf32>
    %c0_5 = arith.constant 0 : index
    %c0_6 = arith.constant 0 : index
    %2 = vector.load %arg3[%c0_5, %c0_6] : memref<8x256xf32, #tpu.memory_space<vmem>>, vector<8x256xf32>
    %3 = vector.shape_cast %0 : vector<2x8x32xf32> to vector<16x32xf32>
    %c0_7 = arith.constant 0 : index
    %c0_8 = arith.constant 0 : index
    %4 = vector.load %arg4[%c0_7, %c0_8] : memref<32x256xf32, #tpu.memory_space<vmem>>, vector<32x256xf32>
    %cst = arith.constant dense<0.000000e+00> : vector<16x256xf32>
    %5 = tpu.matmul %3, %4, %cst {dimension_numbers = #tpu.dot_dimension_numbers<[1], [0], [0], [1], [0, 0, 1, 1], [], []>} : vector<16x32xf32>, vector<32x256xf32>, vector<16x256xf32> -> vector<16x256xf32>
    %6 = vector.shape_cast %2 : vector<8x256xf32> to vector<1x8x256xf32>
    %7 = vector.broadcast %1 : vector<2x1x256xf32> to vector<2x8x256xf32>
    %8 = vector.broadcast %6 : vector<1x8x256xf32> to vector<2x8x256xf32>
    %9 = arith.mulf %7, %8 : vector<2x8x256xf32>
    %10 = vector.shape_cast %9 : vector<2x8x256xf32> to vector<16x256xf32>
    %11 = arith.mulf %10, %5 : vector<16x256xf32>
    %c0_9 = arith.constant 0 : index
    %c0_10 = arith.constant 0 : index
    %12 = vector.load %arg5[%c0_9, %c0_10] : memref<256x8xf32, #tpu.memory_space<vmem>>, vector<256x8xf32>
    %cst_11 = arith.constant dense<0.000000e+00> : vector<16x8xf32>
    %13 = tpu.matmul %11, %12, %cst_11 {dimension_numbers = #tpu.dot_dimension_numbers<[1], [0], [0], [1], [0, 0, 1, 1], [], []>} : vector<16x256xf32>, vector<256x8xf32>, vector<16x8xf32> -> vector<16x8xf32>
    %14 = arith.negf %13 : vector<16x8xf32>
    %15 = math.exp %14 : vector<16x8xf32>
    %cst_12 = arith.constant 1.000000e+00 : f32
    %16 = vector.broadcast %cst_12 : f32 to vector<16x8xf32>
    %17 = arith.addf %16, %15 : vector<16x8xf32>
    %18 = arith.divf %16, %17 : vector<16x8xf32>
    %19 = vector.shape_cast %18 : vector<16x8xf32> to vector<2x8x8xf32>
    %20 = tpu.iota {dimensions = array<i32: 1>} : vector<2x8x8xi32>
    %21 = tpu.iota {dimensions = array<i32: 2>} : vector<2x8x8xi32>
    %22 = arith.cmpi eq, %20, %21 : vector<2x8x8xi32>
    %cst_13 = arith.constant 1.000000e+00 : f32
    %23 = vector.broadcast %cst_13 : f32 to vector<2x8x8xf32>
    %24 = arith.select %22, %23, %19 : vector<2x8x8xi1>, vector<2x8x8xf32>
    %cst_14 = arith.constant 0.00999999977 : f32
    %25 = vector.broadcast %cst_14 : f32 to vector<2x8x8xf32>
    %26 = arith.cmpf ogt, %24, %25 : vector<2x8x8xf32>
    %cst_15 = arith.constant 0.000000e+00 : f32
    %27 = vector.broadcast %cst_15 : f32 to vector<2x8x8xf32>
    %28 = arith.select %26, %24, %27 : vector<2x8x8xi1>, vector<2x8x8xf32>
    %c0_16 = arith.constant 0 : index
    %c0_17 = arith.constant 0 : index
    %c0_18 = arith.constant 0 : index
    %29 = vector.load %arg6[%c0_16, %c0_17, %c0_18] : memref<2x8x8xf32, #tpu.memory_space<vmem>>, vector<2x8x8xf32>
    tpu.vector_store %arg6[%c0_16, %c0_17, %c0_18], %28 {strides = array<i32>} : memref<2x8x8xf32, #tpu.memory_space<vmem>>, vector<2x8x8xf32>,
    return
  }
  func.func @transform_0(%arg0: i32) -> (i32, i32, i32) {
    %c0_i32 = arith.constant 0 : i32
    %c0_i32_0 = arith.constant 0 : i32
    %c0_i32_1 = arith.constant 0 : i32
    return %arg0, %c0_i32, %c0_i32_0 : i32, i32, i32
  }
  func.func @transform_1(%arg0: i32) -> (i32, i32, i32) {
    %c0_i32 = arith.constant 0 : i32
    %c0_i32_0 = arith.constant 0 : i32
    %c0_i32_1 = arith.constant 0 : i32
    return %arg0, %c0_i32, %c0_i32_0 : i32, i32, i32
  }
  func.func @transform_2(%arg0: i32) -> (i32, i32) {
    %c0_i32 = arith.constant 0 : i32
    %c0_i32_0 = arith.constant 0 : i32
    %c0_i32_1 = arith.constant 0 : i32
    return %c0_i32, %c0_i32_0 : i32, i32
  }
  func.func @transform_3(%arg0: i32) -> (i32, i32) {
    %c0_i32 = arith.constant 0 : i32
    %c0_i32_0 = arith.constant 0 : i32
    %c0_i32_1 = arith.constant 0 : i32
    return %c0_i32, %c0_i32_0 : i32, i32
  }
  func.func @transform_4(%arg0: i32) -> (i32, i32) {
    %c0_i32 = arith.constant 0 : i32
    %c0_i32_0 = arith.constant 0 : i32
    %c0_i32_1 = arith.constant 0 : i32
    return %c0_i32, %c0_i32_0 : i32, i32
  }
  func.func @transform_5(%arg0: i32) -> (i32, i32, i32) {
    %c0_i32 = arith.constant 0 : i32
    %c0_i32_0 = arith.constant 0 : i32
    %c0_i32_1 = arith.constant 0 : i32
    return %arg0, %c0_i32, %c0_i32_0 : i32, i32, i32
  }
}

</mosaic_0001>

<bundles_post_ra>
// kernel: tpu_custom_call.1
= control target key start
LH: loop header
LB: loop body
LE: loop exit
PB: predicated region body
PF: predicated region fallthrough
CT: control target
= control target key end

     0   :  { %10 = vsyncpa [#allocation3], 0  ;;  %s1081_s0 = inlined_call_operand.vmem [shape: f32[8,8,32], index: 0, kind: input, shape index: {}]   ;;  %s1082_s1 = inlined_call_operand.vmem [shape: f32[8,1,256], index: 1, kind: input, shape index: {}]   ;;  %s1083_s2 = inlined_call_operand.vmem [shape: f32[8,256], index: 2, kind: input, shape index: {}]   ;;  %s1084_s3 = inlined_call_operand.vmem [shape: f32[32,256], index: 3, kind: input, shape index: {}]   ;;  %s1085_s4 = inlined_call_operand.vmem [shape: f32[256,8], index: 4, kind: input, shape index: {}]   ;;  %s1086_s5 = inlined_call_operand.hbm [shape: f32[8,8,8], index: 5, kind: output, shape index: {}]  }
   0x1   :  { %12 = vsyncpa [#allocation3 + $0x1], 0  ;;  %s842_s18 = smov 0   ;;  %s844_s19 = smov 0  }
   0x2   :  { %s846_s20 = smov 0   ;;  %s848_s21 = smov 0  }
   0x3 LB: > { %s863_s22 = sadd.s32 4294967295, %s806_s21   ;;  %s597_s23 = sadd.s32 4294967294, %s806_s21   ;;  %s806_s21 = sphi %s848_s21, %s1092_s21   ;;  %s802_s20 = sphi %s846_s20, %s1091_s20   ;;  %s798_s19 = sphi %s844_s19, %s1090_s19   ;;  %s794_s18 = sphi %s842_s18, %s1089_s18  }
   0x4   : > { %s867_s24 = sadd.s32 1, %s806_s21   ;;  %s140_s25 = sadd.s32 1, %s802_s20 }
   0x5   : > { %s137_s26 = ssub.s32 %s806_s21, %s867_s24  ;;  %p150_p0 = scmp.ne.s32.totalorder %s802_s20, %s798_s19 }
   0x6   : > { %p138_p1 = scmp.eq.s32.totalorder %s137_s26, 0  ;;  %p151_p2 = scmp.eq.s32.totalorder %s863_s22, 3 }
   0x7   : > { %p156_p3 = scmp.ne.s32.totalorder %s798_s19, %s794_s18  ;;  %p157_p4 = scmp.eq.s32.totalorder %s597_s23, 3 }
   0x8   : > { %s878_s27 = scalar_select %p138_p1, %s802_s20, %s140_s25  }
   0x9   : > { %p880_p5 = por %p151_p2, %p150_p0  ;;  %p884_p6 = por %p157_p4, %p156_p3 }
   0xa   : > { %p600_p7 = scmp.ge.s32.totalorder %s806_s21, 1  ;;  %p202_p8 = scmp.lt.s32.totalorder %s806_s21, 5 }
   0xc   : > { %p203_p9 = pnand %p600_p7, %p202_p8 }
   0xd   : > { %v255_v0 = vld [vmem:[%s1084_s3 + $0x8] sm:$0xff] (!%p203_p9)  ;;  %v257_v1 = vld [vmem:[%s1084_s3 + $0x18] sm:$0xff] (!%p203_p9)  ;;  %v254_v2 = vld [vmem:[%s1084_s3] sm:$0xff] (!%p203_p9)  ;;  %s602_s11 = sshll.u32 (!%p203_p9), %s863_s22, 1  ;;  %v808_v7 = vmov (!%p203_p9), 0.0   ;;  %vm262_vm0 = vcmask (!%p203_p9), 261120   ;;  %v348_v57 = vlaneseq (!%p203_p9) }
   0xe   : > { %206 = sbr.rel (%p203_p9) target bundleno = 504 (0x1f8), region = 40  ;;  %v654_v3 = vpack.c.bf16 (!%p203_p9), %v257_v1, %v255_v0  ;;  %v256_v4 = vld [vmem:[%s1084_s3 + $0x10] sm:$0xff] (!%p203_p9)  ;;  %v259_v5 = vld [vmem:[%s1084_s3 + $0x28] sm:$0xff] (!%p203_p9)  ;;  %v261_v6 = vld [vmem:[%s1084_s3 + $0x38] sm:$0xff] (!%p203_p9)  ;;  %333 = vmatprep.mubr.f32.mxu0 (!%p203_p9), %v808_v7  ;;  %p236_p10 = scmp.lt.s32.totalorder (!%p203_p9), %s602_s11, 7  ;;  %vm506_vm2 = vcmask (!%p203_p9), 64512  }
   0xf   : > { %v656_v8 = vpack.c.bf16 (!%p203_p9), %v256_v4, %v254_v2  ;;  %v658_v9 = vpack.c.bf16 (!%p203_p9), %v261_v6, %v259_v5  ;;  %v258_v10 = vld [vmem:[%s1084_s3 + $0x20] sm:$0xff] (!%p203_p9)  ;;  %v260_v11 = vld [vmem:[%s1084_s3 + $0x30] sm:$0xff] (!%p203_p9)  ;;  %v393_v13 = vld [vmem:[%s1085_s4 + $0x88] sm:$0xff] (!%p203_p9)  ;;  %v349_v0 = vshrl.u32 (!%p203_p9), %v348_v57, 7  ;;  %v498_v1 = vand.u32 (!%p203_p9), 127, %v348_v57  ;;  %s615_s8 = sshll.u32 (!%p203_p9), %s863_s22, 8 }
  0x10   : > { %v392_v12 = vld [vmem:[%s1085_s4 + $0x80] sm:$0xff] (!%p203_p9)  ;;  %655 = vmatprep.subr.bf16.mxu0 (!%p203_p9), %v654_v3  ;;  %v377_v15 = vld [vmem:[%s1085_s4 + $0x8] sm:$0xff] (!%p203_p9)  ;;  %v660_v16 = vpack.c.bf16 (!%p203_p9), %v260_v11, %v258_v10  ;;  %v394_v19 = vld [vmem:[%s1085_s4 + $0x90] sm:$0xff] (!%p203_p9)  ;;  %s1036_s14 = scalar_lea.hbm (!%p203_p9), %s1086_s5, %s615_s8  ;;  %s809_s17 = smov (!%p203_p9), [#allocation2]  }
  0x11   : > { %v376_v14 = vld [vmem:[%s1085_s4] sm:$0xff] (!%p203_p9)  ;;  %657 = vmatpush1.bf16.msra.mxu0 (!%p203_p9), %v656_v8  ;;  %v662_v17 = vpack.c.bf16 (!%p203_p9), %v393_v13, %v392_v12  ;;  %v395_v20 = vld [vmem:[%s1085_s4 + $0x98] sm:$0xff] (!%p203_p9)  ;;  %v378_v21 = vld [vmem:[%s1085_s4 + $0x10] sm:$0xff] (!%p203_p9)  ;;  %vm499_vm1 = vcmp.eq.s32.totalorder (!%p203_p9), %v349_v0, %v498_v1  ;;  %v350_v2 = vsub.s32 (!%p203_p9), 0, %v349_v0  ;;  %v354_v4 = vsub.s32 (!%p203_p9), 1, %v349_v0 }
  0x12   : > { %v664_v18 = vpack.c.bf16 (!%p203_p9), %v377_v15, %v376_v14  ;;  %659 = vmatprep.subr.bf16.mxu0 (!%p203_p9), %v658_v9  ;;  %v666_v22 = vpack.c.bf16 (!%p203_p9), %v395_v20, %v394_v19  ;;  %v379_v23 = vld [vmem:[%s1085_s4 + $0x18] sm:$0xff] (!%p203_p9)  ;;  %v396_v24 = vld [vmem:[%s1085_s4 + $0xa0] sm:$0xff] (!%p203_p9)  ;;  %v397_v25 = vld [vmem:[%s1085_s4 + $0xa8] sm:$0xff] (!%p203_p9) }
  0x13   : > { %663 = vmatprep.subr.bf16.mxu1 (!%p203_p9), %v662_v17  ;;  %v668_v26 = vpack.c.bf16 (!%p203_p9), %v379_v23, %v378_v21  ;;  %v670_v28 = vpack.c.bf16 (!%p203_p9), %v397_v25, %v396_v24  ;;  %v380_v29 = vld [vmem:[%s1085_s4 + $0x20] sm:$0xff] (!%p203_p9)  ;;  %v381_v30 = vld [vmem:[%s1085_s4 + $0x28] sm:$0xff] (!%p203_p9)  ;;  %v398_v31 = vld [vmem:[%s1085_s4 + $0xb0] sm:$0xff] (!%p203_p9) }
  0x14   : > { %665 = vmatpush3.bf16.msra.mxu1 (!%p203_p9), %v664_v18  ;;  %v399_v32 = vld [vmem:[%s1085_s4 + $0xb8] sm:$0xff] (!%p203_p9)  ;;  %v672_v33 = vpack.c.bf16 (!%p203_p9), %v381_v30, %v380_v29  ;;  %v382_v36 = vld [vmem:[%s1085_s4 + $0x30] sm:$0xff] (!%p203_p9)  ;;  %v400_v38 = vld [vmem:[%s1085_s4 + $0xc0] sm:$0xff] (!%p203_p9) }
  0x15   : > { %s1094_s11 = smov (!%p236_p10, %s602_s11), 7  ;;  %661 = vmatpush1.bf16.msra.mxu0 %v660_v16  ;;  %667 = vmatprep.subr.bf16.mxu1 %v666_v22  ;;  %v674_v35 = vpack.c.bf16 %v399_v32, %v398_v31  ;;  %v383_v37 = vld [vmem:[%s1085_s4 + $0x38] sm:$0xff]  ;;  %v401_v39 = vld [vmem:[%s1085_s4 + $0xc8] sm:$0xff]  ;;  %v384_v42 = vld [vmem:[%s1085_s4 + $0x40] sm:$0xff] }
  0x16   : > { %s603_s30 = sshll.u32 %s1094_s11, 3  ;;  %v676_v40 = vpack.c.bf16 %v383_v37, %v382_v36  ;;  %v678_v41 = vpack.c.bf16 %v401_v39, %v400_v38  ;;  %v385_v43 = vld [vmem:[%s1085_s4 + $0x48] sm:$0xff]  ;;  %v402_v44 = vld [vmem:[%s1085_s4 + $0xd0] sm:$0xff]  ;;  %v403_v45 = vld [vmem:[%s1085_s4 + $0xd8] sm:$0xff]  ;;  %s605_s16 = sshll.u32 %s1094_s11, 1 }
  0x17   : > { %s239_s15 = scalar_lea.vmem %s1081_s0, %s603_s30  ;;  %v680_v46 = vpack.c.bf16 %v385_v43, %v384_v42  ;;  %v682_v47 = vpack.c.bf16 %v403_v45, %v402_v44  ;;  %v386_v48 = vld [vmem:[%s1085_s4 + $0x50] sm:$0xff]  ;;  %v387_v49 = vld [vmem:[%s1085_s4 + $0x58] sm:$0xff]  ;;  %v404_v50 = vld [vmem:[%s1085_s4 + $0xe0] sm:$0xff]  ;;  %s245_s23 = scalar_lea.vmem %s1082_s1, %s605_s16 }
  0x18   : > { %v248_v27 = vld [vmem:[%s239_s15] sm:$0xff]  ;;  %669 = vmatpush3.bf16.msra.mxu1 %v668_v26  ;;  %v249_v34 = vld [vmem:[%s239_s15 + $0x8] sm:$0xff]  ;;  %v684_v52 = vpack.c.bf16 %v387_v49, %v386_v48  ;;  %v406_v58 = vld [vmem:[%s1085_s4 + $0xf0] sm:$0xff]  ;;  %s232_s11 = sand.u32 1, %s798_s19   ;;  %s748_s15 = sshll.u32 %s809_s17, 4  ;;  %s749_s15 = int_to_ptr.vmem [resolvable:$false] %s748_s15 }
  0x19   : > { %606 = vmatmul.mubr.msk.f32.vlgmr.msra.gmra.mrb[0].mxu0 %vm262_vm0, %v248_v27  ;;  %671 = vmatprep.subr.bf16.mxu1 %v670_v28  ;;  %v405_v51 = vld [vmem:[%s1085_s4 + $0xe8] sm:$0xff]  ;;  %v388_v54 = vld [vmem:[%s1085_s4 + $0x60] sm:$0xff]  ;;  %v407_v59 = vld [vmem:[%s1085_s4 + $0xf8] sm:$0xff]  ;;  %s601_s7 = sshll.u32 %s232_s11, 4  ;;  %s1040_s22 = scalar_lea.sflag [#allocation3], %s232_s11 }
  0x1a   : > { %339 = vmatprep.mubr.f32.mxu0 %v808_v7  ;;  %v686_v53 = vpack.c.bf16 %v405_v51, %v404_v50  ;;  %v389_v55 = vld [vmem:[%s1085_s4 + $0x68] sm:$0xff]  ;;  %v690_v60 = vpack.c.bf16 %v407_v59, %v406_v58  ;;  %v390_v61 = vld [vmem:[%s1085_s4 + $0x70] sm:$0xff]  ;;  %v391_v62 = vld [vmem:[%s1085_s4 + $0x78] sm:$0xff]  ;;  %s234_s9 = scalar_lea.vmem [#allocation2], %s601_s7 }
  0x1b   : > { %v688_v56 = vpack.c.bf16 %v389_v55, %v388_v54  ;;  %v692_v63 = vpack.c.bf16 %v391_v62, %v390_v61  ;;  %v250_v3 = vld [vmem:[%s245_s23] sm:$0x3]  ;;  %v251_v7 = vld [vmem:[%s245_s23 + $0x2] sm:$0x3]  ;;  %v253_v9 = vld [vmem:[%s1083_s2 + $0x8] sm:$0xff]  ;;  %s523_s10 = sshll.u32 %s234_s9, 4  ;;  %s1038_s10 = int_to_ptr.vmem [resolvable:$true] %s523_s10 }
  0x1c   : > { %673 = vmatpush3.bf16.msra.mxu1 %v672_v33  ;;  %v351_v5 = vrot.slane %v250_v3, %v350_v2  ;;  %v252_v6 = vld [vmem:[%s1083_s2] sm:$0xff]  ;;  %v355_v8 = vrot.slane %v250_v3, %v354_v4  ;;  %v359_v11 = vrot.slane %v251_v7, %v350_v2  ;;  %v363_v13 = vrot.slane %v251_v7, %v354_v4  ;;  %s744_s16 = scalar_lea.vmem %s1038_s10, 256  ;;  %s750_s23 = scalar_lea.vmem %s749_s15, 512 }
  0x1d   : > { %607 = vmatmul.mubr.msk.f32.gmra.mrb[2].mxu0 %vm262_vm0, %v249_v34  ;;  %675 = vmatprep.subr.bf16.mxu1 %v674_v35  ;;  %p745_p11 = scmp.ne.s32.totalorder %s1038_s10, %s744_s16  ;;  %p751_p0 = scmp.lt.s32.totalorder %s1038_s10, %s749_s15 }
  0x1e   : > { %v368_v10 = vmul.f32 %v351_v5, %v252_v6  ;;  %v369_v12 = vmul.f32 %v355_v8, %v253_v9  ;;  %v370_v17 = vmul.f32 %v359_v11, %v252_v6  ;;  %v371_v19 = vmul.f32 %v363_v13, %v253_v9  ;;  %p752_p1 = scmp.lt.s32.totalorder %s750_s23, %s744_s16 }
  0x1f   : > { %p746_p12 = pnand %p745_p11, %p880_p5 }
  0x20   : > { %677 = vmatpush3.bf16.msra.mxu1 %v676_v40  ;;  %p753_p2 = por %p752_p1, %p751_p0 }
  0x21   : > { %679 = vmatprep.subr.bf16.mxu1 %v678_v41  ;;  %p747_p13 = pneg %p746_p12 }
  0x23   : > { %p754_p3 = pnand %p753_p2, %p747_p13 }
  0x24   : > { %681 = vmatpush3.bf16.msra.mxu1 %v680_v46 }
  0x25   : > { %683 = vmatprep.subr.bf16.mxu1 %v682_v47 }
  0x28   : > { %685 = vmatpush3.bf16.msra.mxu1 %v684_v52 }
  0x29   : > { %687 = vmatprep.subr.bf16.mxu1 %v686_v53 }
  0x2c   : > { %689 = vmatpush3.bf16.msra.mxu1 %v688_v56 }
  0x2d   : > { %691 = vmatprep.subr.bf16.mxu1 %v690_v60 }
  0x30   : > { %693 = vmatpush3.bf16.msra.mxu1 %v692_v63 }
  0xec   : > { %v335_v14 = vpop.f32.mrb[0].mxu0 }
  0xed   : > { %v372_v15 = vmul.f32 %v368_v10, %v335_v14  ;;  %v337_v16 = vpop.f32.mrb[1].mxu0 }
  0xee   : > { %v373_v18 = vmul.f32 %v369_v12, %v337_v16 }
  0xf0   : > { %v341_v20 = vpop.f32.mrb[2].mxu0  ;;  %472 = vmatprep.mubr.f32.mxu1 %v373_v18 }
  0xf1   : > { %v374_v21 = vmul.f32 %v370_v17, %v341_v20  ;;  %v343_v22 = vpop.f32.mrb[3].mxu0  ;;  %473 = vmatmul.mubr.f32.vlgmr.msra.gmra.mrb[0].mxu1 %v372_v15 }
  0xf2   : > { %v375_v23 = vmul.f32 %v371_v19, %v343_v22 }
  0xf4   : > { %477 = vmatprep.mubr.f32.mxu1 %v375_v23 }
  0xf5   : > { %478 = vmatmul.mubr.f32.gmra.mrb[2].mxu1 %v374_v21 }
 0x1c4   : > { %v648_v24 = vpop.f32.mrb[0].mxu1 }
 0x1c5   : > { %v649_v25 = vpop.f32.mrb[1].mxu1 }
 0x1c6   : > { %v650_v26 = vadd.f32 %v649_v25, %v648_v24 }
 0x1c8   : > { %v608_v27 = vmul.f32 -1.442695, %v650_v26  ;;  %v651_v28 = vpop.f32.mrb[2].mxu1 }
 0x1c9   : > { %v652_v29 = vpop.f32.mrb[3].mxu1 }
 0x1ca   : > { %736 = vpow2.f32 %v608_v27  ;;  %v653_v30 = vadd.f32 %v652_v29, %v651_v28 }
 0x1cc   : > { %v609_v31 = vmul.f32 -1.442695, %v653_v30 }
 0x1ce   : > { %738 = vpow2.f32 %v609_v31 }
 0x1d4   : > { %v737_v32 = vpop.eup %736 }
 0x1d5   : > { %v489_v33 = vadd.f32 1.0, %v737_v32 }
 0x1d7   : > { %740 = vrcp.f32 %v489_v33 }
 0x1d8   : > { %v739_v34 = vpop.eup %738 }
 0x1d9   : > { %v490_v35 = vadd.f32 1.0, %v739_v34 }
 0x1db   : > { %742 = vrcp.f32 %v490_v35 }
 0x1e1   : > { %v741_v36 = vpop.eup %740 }
 0x1e2   : > { %v500_v37 = vsel %vm499_vm1, 1.0, %v741_v36 }
 0x1e3   : > { %vm502_vm3 = vcmp.gt.f32.partialorder %v500_v37, 0.01 }
 0x1e4   : > { %v504_v38 = vsel %vm502_vm3, %v500_v37, 0.0 }
 0x1e5   : > { %v743_v39 = vpop.eup %742  ;;  %507 = vst.msk [vmem:[%s234_s9] sm:$0xff] %vm506_vm2, %v504_v38 }
 0x1e6   : > { %v501_v40 = vsel %vm499_vm1, 1.0, %v743_v39 }
 0x1e7   : > { %vm503_vm4 = vcmp.gt.f32.partialorder %v501_v40, 0.01 }
 0x1e8   : > { %v505_v41 = vsel %vm503_vm4, %v501_v40, 0.0 }
 0x1e9   : > { %508 = vst.msk [vmem:[%s234_s9 + $0x8] sm:$0xff] %vm506_vm2, %v505_v41 }
 0x1ea   : > { %757 = shalt.err (!%p754_p3)
}
 0x1eb   : > { %s758_s25 = scalar_lea.hbm %s1036_s14, 256  ;;  %s762_s30 = scalar_lea.hbm %s1086_s5, 1024 }
 0x1ec   : > { %p759_p4 = scmp.ne.s32.totalorder %s1036_s14, %s758_s25  ;;  %p763_p9 = scmp.lt.u32.totalorder %s1036_s14, %s1086_s5 }
 0x1ed   : > { %p764_p10 = scmp.lt.u32.totalorder %s762_s30, %s758_s25  ;;  %p766_p12 = scmp.lt.u32.totalorder %s758_s25, %s1036_s14 }
 0x1ee   : > { %p760_p7 = pnand %p759_p4, %p880_p5 }
 0x1ef   : > { %p765_p11 = por %p764_p10, %p763_p9 }
 0x1f0   : > { %p761_p8 = pneg %p760_p7 }
 0x1f1   : > { %p767_p13 = por %p766_p12, %p765_p11 }
 0x1f3   : > { %p768_p0 = pnand %p767_p13, %p761_p8 }
 0x1f5   : > { %771 = shalt.err (!%p768_p0)
}
 0x1f6   : > { %s810_s8 = smov 128   ;;  %s811_s9 = smov 8  }
 0x1f7   : > { %694 = dma.vmem_to_hbm [thread:$0]  (%p880_p5), %s1038_s10, 256, %s1036_s14, %s1040_s22, %s810_s8, %s810_s8, %s811_s9  }
 0x1f8 PF: > { %p700_p1 = scmp.ge.s32.totalorder %s806_s21, 2  ;;  %s538_s12 = sand.u32 1, %s794_s18  }
 0x1f9   : > { %s539_s13 = scalar_lea.sflag [#allocation3], %s538_s12 }
 0x1fa   : > { %p697_p2 = pnand %p700_p1, %p884_p6 }
 0x1fc   : > { %789 = dma.done.wait (!%p697_p2), %s539_s13, 256  }
 0x1fd   : > { %791 = vsyncadd (!%p697_p2), %s539_s13, 4294967040  ;;  %p15_p3 = scmp.ge.s32.totalorder %s867_s24, 6   ;;  %s1089_s18 = smov %s798_s19 }
 0x1fe   : > { %s1090_s19 = smov %s802_s20  ;;  %s1091_s20 = smov %s878_s27 }
 0x1ff   : > { %s1092_s21 = smov %s867_s24  ;;  %17 = sbr.rel (!%p15_p3) target bundleno = 3 (0x3), region = 78 }
 0x206   :  { %544 = vsyncpa [#allocation3], 1 }
 0x207   :  { %546 = vsyncpa [#allocation3 + $0x1], 1 }

</bundles_post_ra>
